<compile_context>
chip_gen: v7x
topology: tpu7x:2x2x1
jax: 0.10.0
libtpu: 0.0.40
codegen_flags: <defaults>
</compile_context>

<pallas_src>
import functools
import math

import jax
import jax.numpy as jnp
from jax.experimental import pallas as pl
from jax.experimental.pallas import tpu as pltpu


_LANES = 128
# 2048 rows * 128 lanes * 4 B = 1 MiB per f32 input block; with <=3 streams
# double-buffered that is <=6 MiB of VMEM -- safe on v5e/v6e/v7x defaults.
_MAX_BLOCK_ROWS = 2048
# Largest f32 strictly below 2**32 (= 2**32 - 2**8): caps Bernoulli prob at
# 1 - 2**-24 and keeps the float->uint32 convert in range.
_MAX_THRESH_F32 = 4294967040.0


@functools.cache
def _on_tpu():
    return jax.default_backend() == "tpu"


def _compiler_params():
    if _on_tpu():
        # "parallel" lets Mosaic shard the elementwise row loop across the two
        # TensorCores on v7x; harmless (single TC) on v5e/v6e.
        return pltpu.CompilerParams(dimension_semantics=("parallel",))
    return None


# ----------------------------------------------------------------------------
# Kernels
# ----------------------------------------------------------------------------
def _eval_tensor_kernel(data_ref, maskp_ref, out_ref):
    # out = data * (1 - sigmoid(maskp)); math stays in the native dtype
    # (bf16 stays bf16 on v6e/v7x; sigmoid rides the EUP slot).
    p = jax.nn.sigmoid(maskp_ref[...])
    out_ref[...] = (data_ref[...] * (1.0 - p)).astype(out_ref.dtype)


def _make_eval_const_kernel(keep_scale):
    # maskp is a constant fill: out = data * (1 - p); no maskp HBM stream.
    def kernel(data_ref, out_ref):
        out_ref[...] = (data_ref[...] * keep_scale).astype(out_ref.dtype)
    return kernel


def _random_u32(shape):
    bits = pltpu.prng_random_bits(shape)
    if bits.dtype != jnp.uint32:
        bits = pltpu.bitcast(bits, jnp.uint32)
    return bits


def _train_tensor_kernel_tpu(seed_ref, data_ref, maskp_ref, out_ref):
    # Per-block seed so every grid step / TensorCore draws distinct bits.
    pltpu.prng_seed(seed_ref[0] + pl.program_id(0))
    p = jax.nn.sigmoid(maskp_ref[...].astype(jnp.float32))
    # Integer threshold compare: mask fires with prob ~sigmoid(maskp)
    # (capped at 1 - 2**-24, same as a 24-bit uniform).
    thr = jnp.minimum(p * 4294967296.0, _MAX_THRESH_F32).astype(jnp.uint32)
    bits = _random_u32(data_ref.shape)
    out_ref[...] = jnp.where(bits < thr, 0.0, data_ref[...])


def _make_train_const_kernel_tpu(thr_u32):
    def kernel(seed_ref, data_ref, out_ref):
        pltpu.prng_seed(seed_ref[0] + pl.program_id(0))
        bits = _random_u32(data_ref.shape)
        out_ref[...] = jnp.where(bits < jnp.uint32(thr_u32), 0.0, data_ref[...])
    return kernel


# Portable (non-TPU / interpret-mode) training kernels: random bits are
# generated outside with jax.random because pltpu.prng_* only lowers on the
# Mosaic TPU backend.
def _train_tensor_kernel_portable(data_ref, maskp_ref, bits_ref, out_ref):
    p = jax.nn.sigmoid(maskp_ref[...].astype(jnp.float32))
    thr = jnp.minimum(p * 4294967296.0, _MAX_THRESH_F32).astype(jnp.uint32)
    out_ref[...] = jnp.where(bits_ref[...] < thr, 0.0, data_ref[...])


def _make_train_const_kernel_portable(thr_u32):
    def kernel(data_ref, bits_ref, out_ref):
        out_ref[...] = jnp.where(bits_ref[...] < jnp.uint32(thr_u32),
                                 0.0, data_ref[...])
    return kernel


# ----------------------------------------------------------------------------
# Slab / grid helpers (plain-JAX glue)
# ----------------------------------------------------------------------------
def _to_slab(x):
    """Flatten row-major to (rows, 128); pad only a ragged final row."""
    flat = x.reshape(-1)
    n = flat.shape[0]
    pad = (-n) % _LANES
    if pad:  # reshape of a contiguous array is free; only pad when needed
        flat = jnp.pad(flat, (0, pad))
    return flat.reshape(-1, _LANES), n


def _from_slab(slab, n, shape):
    return slab.reshape(-1)[:n].reshape(shape)


def _row_grid(rows):
    block_rows = rows if rows <= _MAX_BLOCK_ROWS else _MAX_BLOCK_ROWS
    return (pl.cdiv(rows, block_rows),), block_rows


def _seed_array(seed):
    """Accept a python int or a device array; return an int32 (1,) array."""
    if isinstance(seed, jax.Array) and seed.dtype == jnp.int32 and seed.shape == (1,):
        return seed
    return jnp.asarray(seed, dtype=jnp.int32).reshape(-1)[:1]


def _host_bits(seed, shape):
    key = jax.random.PRNGKey(jnp.asarray(seed, dtype=jnp.int32).reshape(-1)[0])
    return jax.random.bits(key, shape, dtype=jnp.uint32)


# ----------------------------------------------------------------------------
# pallas_call wrappers
# ----------------------------------------------------------------------------
def bernoulli_param_eval(data, maskp):
    """out = data * (1 - sigmoid(maskp)) (eval mode, per-element maskp)."""
    data_2d, n = _to_slab(data)
    maskp_2d, _ = _to_slab(maskp)
    rows = data_2d.shape[0]
    grid, br = _row_grid(rows)
    out = pl.pallas_call(
        _eval_tensor_kernel,
        out_shape=jax.ShapeDtypeStruct((rows, _LANES), data.dtype),
        grid_spec=pl.GridSpec(
            grid=grid,
            in_specs=[pl.BlockSpec((br, _LANES), lambda i: (i, 0)),
                      pl.BlockSpec((br, _LANES), lambda i: (i, 0))],
            out_specs=pl.BlockSpec((br, _LANES), lambda i: (i, 0)),
        ),
        compiler_params=_compiler_params(),
    )(data_2d, maskp_2d)
    return _from_slab(out, n, data.shape)


def bernoulli_param_eval_const(data, p):
    """out = data * (1 - p); maskp is a constant fill so it is not streamed."""
    data_2d, n = _to_slab(data)
    rows = data_2d.shape[0]
    grid, br = _row_grid(rows)
    out = pl.pallas_call(
        _make_eval_const_kernel(float(1.0 - p)),
        out_shape=jax.ShapeDtypeStruct((rows, _LANES), data.dtype),
        grid_spec=pl.GridSpec(
            grid=grid,
            in_specs=[pl.BlockSpec((br, _LANES), lambda i: (i, 0))],
            out_specs=pl.BlockSpec((br, _LANES), lambda i: (i, 0)),
        ),
        compiler_params=_compiler_params(),
    )(data_2d)
    return _from_slab(out, n, data.shape)


def bernoulli_param_train(data, maskp, seed):
    """out = data with elements zeroed where Bernoulli(sigmoid(maskp)) fires."""
    data_2d, n = _to_slab(data)
    maskp_2d, _ = _to_slab(maskp)
    rows = data_2d.shape[0]
    grid, br = _row_grid(rows)
    out_shape = jax.ShapeDtypeStruct((rows, _LANES), data.dtype)

    if _on_tpu():
        out = pl.pallas_call(
            _train_tensor_kernel_tpu,
            out_shape=out_shape,
            grid_spec=pltpu.PrefetchScalarGridSpec(
                num_scalar_prefetch=1,
                grid=grid,
                in_specs=[pl.BlockSpec((br, _LANES), lambda i, s: (i, 0)),
                          pl.BlockSpec((br, _LANES), lambda i, s: (i, 0))],
                out_specs=pl.BlockSpec((br, _LANES), lambda i, s: (i, 0)),
            ),
            compiler_params=_compiler_params(),
        )(_seed_array(seed), data_2d, maskp_2d)
    else:
        # TODO(synk): pltpu.prng_* has no lowering off the Mosaic TPU backend;
        # off-TPU we stream host-generated random bits instead.
        bits = _host_bits(seed, (rows, _LANES))
        out = pl.pallas_call(
            _train_tensor_kernel_portable,
            out_shape=out_shape,
            grid_spec=pl.GridSpec(
                grid=grid,
                in_specs=[pl.BlockSpec((br, _LANES), lambda i: (i, 0)),
                          pl.BlockSpec((br, _LANES), lambda i: (i, 0)),
                          pl.BlockSpec((br, _LANES), lambda i: (i, 0))],
                out_specs=pl.BlockSpec((br, _LANES), lambda i: (i, 0)),
            ),
        )(data_2d, maskp_2d, bits)
    return _from_slab(out, n, data.shape)


def bernoulli_param_train_const(data, p, seed):
    """Training path when maskp is a constant fill: threshold baked in."""
    data_2d, n = _to_slab(data)
    rows = data_2d.shape[0]
    grid, br = _row_grid(rows)
    out_shape = jax.ShapeDtypeStruct((rows, _LANES), data.dtype)
    thr_u32 = min(int(p * 4294967296.0), 4294967295)

    if _on_tpu():
        out = pl.pallas_call(
            _make_train_const_kernel_tpu(thr_u32),
            out_shape=out_shape,
            grid_spec=pltpu.PrefetchScalarGridSpec(
                num_scalar_prefetch=1,
                grid=grid,
                in_specs=[pl.BlockSpec((br, _LANES), lambda i, s: (i, 0))],
                out_specs=pl.BlockSpec((br, _LANES), lambda i, s: (i, 0)),
            ),
            compiler_params=_compiler_params(),
        )(_seed_array(seed), data_2d)
    else:
        bits = _host_bits(seed, (rows, _LANES))
        out = pl.pallas_call(
            _make_train_const_kernel_portable(thr_u32),
            out_shape=out_shape,
            grid_spec=pl.GridSpec(
                grid=grid,
                in_specs=[pl.BlockSpec((br, _LANES), lambda i: (i, 0)),
                          pl.BlockSpec((br, _LANES), lambda i: (i, 0))],
                out_specs=pl.BlockSpec((br, _LANES), lambda i: (i, 0)),
            ),
        )(data_2d, bits)
    return _from_slab(out, n, data.shape)


# ----------------------------------------------------------------------------
# Module
# ----------------------------------------------------------------------------
def arcsigmoid(p):
    return math.log(p / (1.0 - p))


class BernoulliParameter:
    """JAX/Pallas equivalent of the PyTorch BernoulliParameter (forward only)."""

    def __init__(self, tensor_in, p=None):
        self.data = tensor_in
        if p is None or p <= 0.0 or p >= 1.0:
            self.init_value = None
            self.maskp = jnp.abs(tensor_in)
            self._const_p = None
        else:
            self.init_value = arcsigmoid(p)
            self.maskp = jnp.full(tensor_in.shape, self.init_value, tensor_in.dtype)
            # maskp is a uniform fill at construction; while it stays that way
            # the forward can skip streaming the full maskp tensor.
            self._const_p = float(p)

    def set_maskp(self, maskp):
        """Replace maskp (e.g. after it is trained); disables the const fast path."""
        self.maskp = maskp
        self._const_p = None

    def __call__(self, training=False, seed=0):
        if training:
            if self._const_p is not None:
                return bernoulli_param_train_const(self.data, self._const_p, seed)
            return bernoulli_param_train(self.data, self.maskp, seed)
        if self._const_p is not None:
            return bernoulli_param_eval_const(self.data, self._const_p)
        return bernoulli_param_eval(self.data, self.maskp)


# ----------------------------------------------------------------------------
# Main
# ----------------------------------------------------------------------------
if __name__ == "__main__":
    key = jax.random.PRNGKey(0)
    # Deterministic "parameter" tensor (the module wraps an arbitrary tensor_in).
    tensor_in = jax.random.normal(key, (2, 4, 16, 16), dtype=jnp.float32)

    # Case 1: p=None -> maskp = |tensor_in| (per-element maskp stream).
    module = BernoulliParameter(tensor_in, p=None)

    # Eval mode (deterministic): data * (1 - sigmoid(maskp)).
    out_eval = jax.block_until_ready(module(training=False))
    ref_eval = tensor_in * (1.0 - jax.nn.sigmoid(jnp.abs(tensor_in)))
    assert out_eval.shape == tensor_in.shape
    assert jnp.allclose(out_eval, ref_eval, atol=1e-5), "eval-mode mismatch"

    # Training mode (stochastic): masked_fill(data, Bernoulli(sigmoid(maskp)), 0).
    out_train = jax.block_until_ready(module(training=True, seed=1234))
    assert out_train.shape == tensor_in.shape
    # Every element must be either passed-through data or exactly zero.
    ok = (out_train == tensor_in) | (out_train == 0.0)
    assert bool(jnp.all(ok)), "train-mode mask semantics violated"

    # Case 2: p=0.5 -> constant maskp (arcsigmoid(0.5)=0); eval out = 0.5 * data,
    # and the maskp tensor is never streamed through HBM.
    module2 = BernoulliParameter(tensor_in, p=0.5)
    out_eval2 = jax.block_until_ready(module2(training=False))
    assert jnp.allclose(out_eval2, 0.5 * tensor_in, atol=1e-5)

    out_train2 = jax.block_until_ready(module2(training=True, seed=7))
    ok2 = (out_train2 == tensor_in) | (out_train2 == 0.0)
    assert bool(jnp.all(ok2)), "const-p train-mode mask semantics violated"

    print("KERNEL_OK")
</pallas_src>

<mosaic_0001>
module attributes {stable_mosaic.version = 11 : i64} {
  func.func @_eval_tensor_kernel(%arg0: i32, %arg1: memref<16x128xf32, #tpu.memory_space<vmem>>, %arg2: memref<16x128xf32, #tpu.memory_space<vmem>>, %arg3: memref<16x128xf32, #tpu.memory_space<vmem>>) attributes {dimension_semantics = [#tpu.dimension_semantics<arbitrary>], iteration_bounds = array<i64: 1>, scalar_prefetch = 0 : i64, scratch_operands = 0 : i64, tpu.core_type = #tpu.core_type<tc>, window_params = [{transform_indices = @transform_0, window_bounds = array<i64: 16, 128>}, {transform_indices = @transform_1, window_bounds = array<i64: 16, 128>}, {transform_indices = @transform_2, window_bounds = array<i64: 16, 128>}]} {
    %c0 = arith.constant 0 : index
    %c0_0 = arith.constant 0 : index
    %0 = vector.load %arg2[%c0, %c0_0] : memref<16x128xf32, #tpu.memory_space<vmem>>, vector<16x128xf32>
    %1 = arith.negf %0 : vector<16x128xf32>
    %2 = math.exp %1 : vector<16x128xf32>
    %cst = arith.constant 1.000000e+00 : f32
    %3 = vector.broadcast %cst : f32 to vector<16x128xf32>
    %4 = arith.addf %3, %2 : vector<16x128xf32>
    %5 = arith.divf %3, %4 : vector<16x128xf32>
    %c0_1 = arith.constant 0 : index
    %c0_2 = arith.constant 0 : index
    %6 = vector.load %arg1[%c0_1, %c0_2] : memref<16x128xf32, #tpu.memory_space<vmem>>, vector<16x128xf32>
    %cst_3 = arith.constant 1.000000e+00 : f32
    %7 = vector.broadcast %cst_3 : f32 to vector<16x128xf32>
    %8 = arith.subf %7, %5 : vector<16x128xf32>
    %9 = arith.mulf %6, %8 : vector<16x128xf32>
    %c0_4 = arith.constant 0 : index
    %c0_5 = arith.constant 0 : index
    %10 = vector.load %arg3[%c0_4, %c0_5] : memref<16x128xf32, #tpu.memory_space<vmem>>, vector<16x128xf32>
    tpu.vector_store %arg3[%c0_4, %c0_5], %9 {strides = array<i32>} : memref<16x128xf32, #tpu.memory_space<vmem>>, vector<16x128xf32>,
    return
  }
  func.func @transform_0(%arg0: i32) -> (i32, i32) {
    %c0_i32 = arith.constant 0 : i32
    %c0_i32_0 = arith.constant 0 : i32
    return %arg0, %c0_i32 : i32, i32
  }
  func.func @transform_1(%arg0: i32) -> (i32, i32) {
    %c0_i32 = arith.constant 0 : i32
    %c0_i32_0 = arith.constant 0 : i32
    return %arg0, %c0_i32 : i32, i32
  }
  func.func @transform_2(%arg0: i32) -> (i32, i32) {
    %c0_i32 = arith.constant 0 : i32
    %c0_i32_0 = arith.constant 0 : i32
    return %arg0, %c0_i32 : i32, i32
  }
}

</mosaic_0001>

<bundles_post_ra>
// kernel: tpu_custom_call.1
= control target key start
LH: loop header
LB: loop body
LE: loop exit
PB: predicated region body
PF: predicated region fallthrough
CT: control target
= control target key end

     0   :  { %7 = vsyncpa [#allocation3], 0  ;;  %s232_s0 = inlined_call_operand.hbm [shape: f32[16,128], index: 0, kind: input, shape index: {}]   ;;  %s233_s1 = inlined_call_operand.hbm [shape: f32[16,128], index: 1, kind: input, shape index: {}]   ;;  %s234_s2 = inlined_call_operand.hbm [shape: f32[16,128], index: 2, kind: output, shape index: {}]  }
   0x1   :  { %8 = vsyncpa [#allocation6], 0 }
   0x2   :  { %9 = vsyncpa [#allocation4], 0  ;;  %s167_s9 = smov [#allocation2]   ;;  %s95_s13 = scalar_lea.hbm %s232_s0, 256 }
   0x3   :  { %s15_s10 = sshll.u32 %s167_s9, 4  ;;  %p96_p0 = scmp.ne.s32.totalorder %s232_s0, %s95_s13  ;;  %s16_s10 = int_to_ptr.vmem [resolvable:$true] %s15_s10 }
   0x4   :  { %p99_p1 = scmp.lt.u32.totalorder %s95_s13, %s232_s0 }
   0x6   :  { %p101_p2 = pnand %p99_p1, %p96_p0 }
   0x8   :  { %104 = shalt.err (!%p101_p2)
}
   0x9   :  { %s105_s18 = scalar_lea.vmem %s16_s10, 256  ;;  %p110_p4 = scmp.lt.s32.totalorder %s16_s10, %s16_s10 }
   0xa   :  { %p106_p3 = scmp.ne.s32.totalorder %s16_s10, %s105_s18  ;;  %p111_p5 = scmp.lt.s32.totalorder %s105_s18, %s105_s18 }
   0xc   :  { %p112_p6 = por %p111_p5, %p110_p4 }
   0xe   :  { %p113_p7 = pnand %p112_p6, %p106_p3 }
  0x10   :  { %116 = shalt.err (!%p113_p7)
}
  0x11   :  { %s168_s19 = smov 128   ;;  %s169_s20 = smov 8  }
  0x12   :  { %21 = dma.hbm_to_vmem [thread:$0]  %s232_s0, 256, %s16_s10, [#allocation3], %s168_s19, %s168_s19, %s169_s20  }
  0x13   :  { %s170_s23 = smov [#allocation5]   ;;  %s117_s27 = scalar_lea.hbm %s233_s1, 256 }
  0x14   :  { %s27_s24 = sshll.u32 %s170_s23, 4  ;;  %p118_p8 = scmp.ne.s32.totalorder %s233_s1, %s117_s27  ;;  %s28_s24 = int_to_ptr.vmem [resolvable:$true] %s27_s24 }
  0x15   :  { %p121_p9 = scmp.lt.u32.totalorder %s117_s27, %s233_s1 }
  0x17   :  { %p123_p10 = pnand %p121_p9, %p118_p8 }
  0x19   :  { %126 = shalt.err (!%p123_p10)
}
  0x1a   :  { %s127_s4 = scalar_lea.vmem %s28_s24, 256  ;;  %p132_p12 = scmp.lt.s32.totalorder %s28_s24, %s28_s24 }
  0x1b   :  { %p128_p11 = scmp.ne.s32.totalorder %s28_s24, %s127_s4  ;;  %p133_p13 = scmp.lt.s32.totalorder %s127_s4, %s127_s4 }
  0x1d   :  { %p134_p0 = por %p133_p13, %p132_p12 }
  0x1f   :  { %p135_p1 = pnand %p134_p0, %p128_p11 }
  0x21   :  { %138 = shalt.err (!%p135_p1)
}
  0x22   :  { %33 = dma.hbm_to_vmem [thread:$0]  %s233_s1, 256, %s28_s24, [#allocation6], %s168_s19, %s168_s19, %s169_s20  }
  0x23   :  { %161 = dma.done.wait [#allocation3], 256  }
  0x24   :  { %162 = vsyncadd [#allocation3], 4294967040 }
  0x25   :  { %163 = dma.done.wait [#allocation6], 256  }
  0x26   :  { %164 = vsyncadd [#allocation6], 4294967040  ;;  %v40_v0 = vld [vmem:[#allocation5] sm:$0xff]  ;;  %v41_v1 = vld [vmem:[#allocation5 + $0x8] sm:$0xff]  ;;  %s171_s1 = smov [#allocation7]  }
  0x27   :  { %v80_v2 = vmul.f32 -1.442695, %v40_v0  ;;  %v81_v3 = vmul.f32 -1.442695, %v41_v1  ;;  %v54_v9 = vld [vmem:[#allocation2] sm:$0xff]  ;;  %v55_v12 = vld [vmem:[#allocation2 + $0x8] sm:$0xff] }
  0x28   :  { %s67_s6 = sshll.u32 %s171_s1, 4  ;;  %s68_s6 = int_to_ptr.vmem [resolvable:$true] %s67_s6 }
  0x29   :  { %87 = vpow2.f32 %v80_v2  ;;  %s139_s7 = scalar_lea.vmem %s68_s6, 256  ;;  %p144_p3 = scmp.lt.s32.totalorder %s68_s6, %s68_s6 }
  0x2a   :  { %89 = vpow2.f32 %v81_v3  ;;  %p140_p2 = scmp.ne.s32.totalorder %s68_s6, %s139_s7  ;;  %p145_p4 = scmp.lt.s32.totalorder %s139_s7, %s139_s7 }
  0x2c   :  { %p146_p5 = por %p145_p4, %p144_p3 }
  0x2e   :  { %p147_p6 = pnand %p146_p5, %p140_p2 }
  0x33   :  { %v88_v4 = vpop.eup %87 }
  0x34   :  { %v90_v5 = vpop.eup %89  ;;  %v48_v6 = vadd.f32 1.0, %v88_v4 }
  0x35   :  { %v49_v7 = vadd.f32 1.0, %v90_v5 }
  0x36   :  { %91 = vrcp.f32 %v48_v6 }
  0x37   :  { %93 = vrcp.f32 %v49_v7 }
  0x40   :  { %v92_v8 = vpop.eup %91 }
  0x41   :  { %v94_v10 = vpop.eup %93  ;;  %v56_v11 = vsub.f32 1.0, %v92_v8 }
  0x42   :  { %v57_v13 = vsub.f32 1.0, %v94_v10 }
  0x43   :  { %v58_v14 = vmul.f32 %v56_v11, %v54_v9 }
  0x44   :  { %v59_v15 = vmul.f32 %v57_v13, %v55_v12 }
  0x45   :  { %60 = vst [vmem:[#allocation7] sm:$0xff] %v58_v14 }
  0x46   :  { %61 = vst [vmem:[#allocation7 + $0x8] sm:$0xff] %v59_v15 }
  0x47   :  { %150 = shalt.err (!%p147_p6)
}
  0x48   :  { %s151_s10 = scalar_lea.hbm %s234_s2, 256 }
  0x49   :  { %p152_p7 = scmp.ne.s32.totalorder %s234_s2, %s151_s10  ;;  %p155_p8 = scmp.lt.u32.totalorder %s151_s10, %s234_s2 }
  0x4b   :  { %p157_p9 = pnand %p155_p8, %p152_p7 }
  0x4d   :  { %160 = shalt.err (!%p157_p9)
}
  0x4e   :  { %73 = dma.vmem_to_hbm [thread:$0]  %s68_s6, 256, %s234_s2, [#allocation4], %s168_s19, %s168_s19, %s169_s20  }
  0x4f   :  { %165 = dma.done.wait [#allocation4], 256  }
  0x50   :  { %166 = vsyncadd [#allocation4], 4294967040 }
  0x51   :  { %77 = vsyncpa [#allocation3], 1 }
  0x52   :  { %78 = vsyncpa [#allocation6], 1 }
  0x53   :  { %79 = vsyncpa [#allocation4], 1 }

</bundles_post_ra>
